<compile_context>
chip_gen: v5e
topology: v5e:2x2
jax: 0.10.0
libtpu: 0.0.40
codegen_flags: <defaults>
</compile_context>

<pallas_src>
import jax
import jax.numpy as jnp
from jax import lax
from jax.experimental import pallas as pl
from jax.experimental.pallas import tpu as pltpu


def causal_attention_kernel(xq_ref, xf_ref,
                            wq_ref, wk_ref, wv_ref,
                            bq_ref, bk_ref, bv_ref,
                            wout_ref, bout_ref,
                            o_ref,
                            k_scr, v_scr, acc_ref):
    qt = pl.program_id(1)          # query-tile index
    h = pl.program_id(2)           # head index (innermost, reduction axis)
    tq = xq_ref.shape[1]
    T = xf_ref.shape[1]

    # Zero the (tq, C) output-projection accumulator at the first head.
    @pl.when(h == 0)
    def _():
        acc_ref[...] = jnp.zeros_like(acc_ref)

    # ---- K/V projection for this head: computed once per (batch, head) at the
    #      first query tile, cached in VMEM scratch, reused for every qt > 0. ----
    @pl.when(qt == 0)
    def _():
        xf = xf_ref[0].astype(jnp.bfloat16)                               # (T, C)
        kh = jnp.dot(xf, wk_ref[0], preferred_element_type=jnp.float32) + bk_ref[0]
        vh = jnp.dot(xf, wv_ref[0], preferred_element_type=jnp.float32) + bv_ref[0]
        k_scr[h] = kh.astype(jnp.bfloat16)
        v_scr[h] = vh.astype(jnp.bfloat16)

    # ---- Q projection for this query tile / head (bf16 MXU, f32 accumulate) ----
    xq = xq_ref[0].astype(jnp.bfloat16)                                   # (tq, C)
    qh = jnp.dot(xq, wq_ref[0], preferred_element_type=jnp.float32) + bq_ref[0]
    qh = qh.astype(jnp.bfloat16)                                          # (tq, D)

    kh = k_scr[h]                                                         # (T, D) bf16
    vh = v_scr[h]                                                         # (T, D) bf16

    # scores = q @ k^T without materializing the transpose (contract over D).
    # NOTE: the reference module applies NO 1/sqrt(D) scaling.
    s = lax.dot_general(qh, kh, (((1,), (1,)), ((), ())),
                        preferred_element_type=jnp.float32)               # (tq, T)

    # Causal mask with absolute query row indices; use a large finite negative
    # value instead of -inf (robust even if a row were ever fully masked).
    row = qt * tq + lax.broadcasted_iota(jnp.int32, (tq, T), 0)
    col = lax.broadcasted_iota(jnp.int32, (tq, T), 1)
    s = jnp.where(row >= col, s, jnp.float32(-1e30))

    # f32 softmax math (safe on v5e which lacks bf16 VPU/EUP paths).
    m = jnp.max(s, axis=-1, keepdims=True)
    p = jnp.exp(s - m)
    denom = jnp.sum(p, axis=-1, keepdims=True)

    pv = jnp.dot(p.astype(jnp.bfloat16), vh,
                 preferred_element_type=jnp.float32)                      # (tq, D)
    y = pv * pl.reciprocal(denom, approx=True)                            # EUP divide

    # Per-head slice of the output projection, accumulated over heads in f32.
    acc_ref[...] += jnp.dot(y.astype(jnp.bfloat16), wout_ref[0],
                            preferred_element_type=jnp.float32)           # (tq, C)

    @pl.when(h == pl.num_programs(2) - 1)
    def _():
        o_ref[0] = (acc_ref[...] + bout_ref[...]).astype(o_ref.dtype)


def causal_attention(x, w_in, b_in, w_out, b_out, num_heads, *, tq=None):
    """x: (B, T, C); w_in: (C, 3C); b_in: (3C,); w_out: (C, C); b_out: (C,)."""
    B, T, C = x.shape
    H = num_heads
    assert C % H == 0, "n_embed must be divisible by num_heads"
    D = C // H
    if tq is None:
        tq = T if T <= 128 else 128
    assert T % tq == 0 and (tq == T or tq % 8 == 0)
    QT = T // tq

    bf16, f32 = jnp.bfloat16, jnp.float32

    # Reference split order of the fused projection is (k, q, v).
    wk, wq, wv = w_in[:, :C], w_in[:, C:2 * C], w_in[:, 2 * C:]
    bk, bq, bv = b_in[:C], b_in[C:2 * C], b_in[2 * C:]

    def per_head_w(w):      # (C, C) -> (H, C, D), bf16 for the MXU
        return w.reshape(C, H, D).transpose(1, 0, 2).astype(bf16)

    def per_head_b(b):      # (C,) -> (H, 1, D), biases stay f32
        return b.reshape(H, 1, D).astype(f32)

    wq_h, wk_h, wv_h = per_head_w(wq), per_head_w(wk), per_head_w(wv)
    bq_h, bk_h, bv_h = per_head_b(bq), per_head_b(bk), per_head_b(bv)
    wout_h = w_out.reshape(H, D, C).astype(bf16)       # rows h*D:(h+1)*D per head
    bout2 = b_out.reshape(1, C).astype(f32)

    flops = B * (6 * T * C * C          # fused qkv projection
                 + 4 * T * T * C        # q@k^T and p@v over all heads
                 + 2 * T * C * C)       # output projection
    bytes_accessed = 2 * B * T * C * 4 + 4 * C * C * 2 + (3 * C + C) * 4
    cost = pl.CostEstimate(flops=flops,
                           transcendentals=B * H * T * T,
                           bytes_accessed=bytes_accessed)

    return pl.pallas_call(
        causal_attention_kernel,
        out_shape=jax.ShapeDtypeStruct((B, T, C), x.dtype),
        grid=(B, QT, H),
        in_specs=[
            pl.BlockSpec((1, tq, C), lambda b, q, h: (b, q, 0)),   # query rows
            pl.BlockSpec((1, T, C), lambda b, q, h: (b, 0, 0)),    # full rows for K/V
            pl.BlockSpec((1, C, D), lambda b, q, h: (h, 0, 0)),    # Wq head slice
            pl.BlockSpec((1, C, D), lambda b, q, h: (h, 0, 0)),    # Wk head slice
            pl.BlockSpec((1, C, D), lambda b, q, h: (h, 0, 0)),    # Wv head slice
            pl.BlockSpec((1, 1, D), lambda b, q, h: (h, 0, 0)),    # bq head slice
            pl.BlockSpec((1, 1, D), lambda b, q, h: (h, 0, 0)),    # bk head slice
            pl.BlockSpec((1, 1, D), lambda b, q, h: (h, 0, 0)),    # bv head slice
            pl.BlockSpec((1, D, C), lambda b, q, h: (h, 0, 0)),    # Wout head slice
            pl.BlockSpec((1, C), lambda b, q, h: (0, 0)),          # bout
        ],
        out_specs=pl.BlockSpec((1, tq, C), lambda b, q, h: (b, q, 0)),
        scratch_shapes=[
            pltpu.VMEM((H, T, D), bf16),   # cached K heads for current batch elem
            pltpu.VMEM((H, T, D), bf16),   # cached V heads for current batch elem
            pltpu.VMEM((tq, C), f32),      # output-projection accumulator
        ],
        compiler_params=pltpu.CompilerParams(
            dimension_semantics=("parallel", "arbitrary", "arbitrary")),
        cost_estimate=cost,
    )(x, x, wq_h, wk_h, wv_h, bq_h, bk_h, bv_h, wout_h, bout2)


def reference(x, w_in, b_in, w_out, b_out, num_heads):
    """f32 replica of the PyTorch CausalAttention forward."""
    B, T, C = x.shape
    D = C // num_heads
    proj = x @ w_in + b_in
    k, q, v = jnp.split(proj, 3, axis=-1)              # (k, q, v) order

    def heads(z):
        return z.reshape(B, T, num_heads, D).transpose(0, 2, 1, 3)

    q, k, v = heads(q), heads(k), heads(v)
    s = q @ jnp.swapaxes(k, -1, -2)                     # no 1/sqrt(D) scaling
    mask = jnp.tril(jnp.ones((T, T), dtype=bool))
    s = jnp.where(mask, s, -jnp.inf)
    p = jax.nn.softmax(s, axis=-1)
    y = (p @ v).transpose(0, 2, 1, 3).reshape(B, T, C)
    return y @ w_out + b_out


if __name__ == "__main__":
    # Small config consistent with GPTConfig structure:
    B, T, C, H = 2, 8, 32, 4          # batch, seq, n_embed, num_transformer_heads
    key = jax.random.PRNGKey(0)
    ks = jax.random.split(key, 5)
    scale = 0.02

    x = jax.random.normal(ks[0], (B, T, C), jnp.float32)
    w_in = scale * jax.random.normal(ks[1], (C, 3 * C), jnp.float32)
    b_in = scale * jax.random.normal(ks[2], (3 * C,), jnp.float32)
    w_out = scale * jax.random.normal(ks[3], (C, C), jnp.float32)
    b_out = scale * jax.random.normal(ks[4], (C,), jnp.float32)

    out = causal_attention(x, w_in, b_in, w_out, b_out, num_heads=H)
    out = jax.block_until_ready(out)

    ref = reference(x, w_in, b_in, w_out, b_out, H)
    assert out.shape == (B, T, C)
    max_err = float(jnp.max(jnp.abs(out - ref)))
    # bf16 MXU matmuls + approx reciprocal vs f32 reference
    assert jnp.allclose(out, ref, atol=2e-2, rtol=2e-2), max_err

    print("KERNEL_OK")
</pallas_src>

<mosaic_0001>
module attributes {stable_mosaic.version = 11 : i64} {
  func.func @causal_attention_kernel(%arg0: i32, %arg1: i32, %arg2: i32, %arg3: memref<1x8x32xf32, #tpu.memory_space<vmem>>, %arg4: memref<1x8x32xf32, #tpu.memory_space<vmem>>, %arg5: memref<1x32x8xbf16, #tpu.memory_space<vmem>>, %arg6: memref<1x32x8xbf16, #tpu.memory_space<vmem>>, %arg7: memref<1x32x8xbf16, #tpu.memory_space<vmem>>, %arg8: memref<1x1x8xf32, #tpu.memory_space<vmem>>, %arg9: memref<1x1x8xf32, #tpu.memory_space<vmem>>, %arg10: memref<1x1x8xf32, #tpu.memory_space<vmem>>, %arg11: memref<1x8x32xbf16, #tpu.memory_space<vmem>>, %arg12: memref<1x32xf32, #tpu.memory_space<vmem>>, %arg13: memref<1x8x32xf32, #tpu.memory_space<vmem>>, %arg14: memref<4x8x8xbf16, #tpu.memory_space<vmem>>, %arg15: memref<4x8x8xbf16, #tpu.memory_space<vmem>>, %arg16: memref<8x32xf32, #tpu.memory_space<vmem>>) attributes {dimension_semantics = [#tpu.dimension_semantics<parallel>, #tpu.dimension_semantics<arbitrary>, #tpu.dimension_semantics<arbitrary>], iteration_bounds = array<i64: 2, 1, 4>, scalar_prefetch = 0 : i64, scratch_operands = 3 : i64, tpu.core_type = #tpu.core_type<tc>, window_params = [{transform_indices = @transform_0, window_bounds = array<i64: 1, 8, 32>}, {transform_indices = @transform_1, window_bounds = array<i64: 1, 8, 32>}, {transform_indices = @transform_2, window_bounds = array<i64: 1, 32, 8>}, {transform_indices = @transform_3, window_bounds = array<i64: 1, 32, 8>}, {transform_indices = @transform_4, window_bounds = array<i64: 1, 32, 8>}, {transform_indices = @transform_5, window_bounds = array<i64: 1, 1, 8>}, {transform_indices = @transform_6, window_bounds = array<i64: 1, 1, 8>}, {transform_indices = @transform_7, window_bounds = array<i64: 1, 1, 8>}, {transform_indices = @transform_8, window_bounds = array<i64: 1, 8, 32>}, {pipeline_mode = #tpu.pipeline_mode<synchronous>, transform_indices = @transform_9, window_bounds = array<i64: 1, 32>}, {transform_indices = @transform_10, window_bounds = array<i64: 1, 8, 32>}]} {
    %c0_i32 = arith.constant 0 : i32
    %0 = arith.cmpi eq, %arg2, %c0_i32 : i32
    %1 = arith.extui %0 : i1 to i32
    %c0_i32_0 = arith.constant 0 : i32
    %2 = arith.cmpi ne, %1, %c0_i32_0 : i32
    scf.if %2 {
      %cst_29 = arith.constant 0.000000e+00 : f32
      %54 = vector.broadcast %cst_29 : f32 to vector<8x32xf32>
      %c0_30 = arith.constant 0 : index
      %c0_31 = arith.constant 0 : index
      %55 = vector.load %arg16[%c0_30, %c0_31] : memref<8x32xf32, #tpu.memory_space<vmem>>, vector<8x32xf32>
      tpu.vector_store %arg16[%c0_30, %c0_31], %54 {strides = array<i32>} : memref<8x32xf32, #tpu.memory_space<vmem>>, vector<8x32xf32>,
    } else {
    }
    %c0_i32_1 = arith.constant 0 : i32
    %3 = arith.cmpi eq, %arg1, %c0_i32_1 : i32
    %4 = arith.extui %3 : i1 to i32
    %c0_i32_2 = arith.constant 0 : i32
    %5 = arith.cmpi ne, %4, %c0_i32_2 : i32
    scf.if %5 {
      %c0_29 = arith.constant 0 : index
      %c0_30 = arith.constant 0 : index
      %c0_31 = arith.constant 0 : index
      %54 = vector.load %arg4[%c0_29, %c0_30, %c0_31] : memref<1x8x32xf32, #tpu.memory_space<vmem>>, vector<1x8x32xf32>
      %55 = vector.shape_cast %54 : vector<1x8x32xf32> to vector<8x32xf32>
      %56 = arith.truncf %55 : vector<8x32xf32> to vector<8x32xbf16>
      %c0_32 = arith.constant 0 : index
      %c0_33 = arith.constant 0 : index
      %c0_34 = arith.constant 0 : index
      %57 = vector.load %arg6[%c0_32, %c0_33, %c0_34] : memref<1x32x8xbf16, #tpu.memory_space<vmem>>, vector<1x32x8xbf16>
      %58 = vector.shape_cast %57 : vector<1x32x8xbf16> to vector<32x8xbf16>
      %cst_35 = arith.constant dense<0.000000e+00> : vector<8x8xf32>
      %59 = tpu.matmul %56, %58, %cst_35 {dimension_numbers = #tpu.dot_dimension_numbers<[1], [0], [0], [1], [0, 0, 1, 1], [], []>} : vector<8x32xbf16>, vector<32x8xbf16>, vector<8x8xf32> -> vector<8x8xf32>
      %c0_36 = arith.constant 0 : index
      %c0_37 = arith.constant 0 : index
      %c0_38 = arith.constant 0 : index
      %60 = vector.load %arg9[%c0_36, %c0_37, %c0_38] : memref<1x1x8xf32, #tpu.memory_space<vmem>>, vector<1x1x8xf32>
      %61 = vector.shape_cast %60 : vector<1x1x8xf32> to vector<1x8xf32>
      %62 = vector.broadcast %61 : vector<1x8xf32> to vector<8x8xf32>
      %63 = arith.addf %59, %62 : vector<8x8xf32>
      %c0_39 = arith.constant 0 : index
      %c0_40 = arith.constant 0 : index
      %c0_41 = arith.constant 0 : index
      %64 = vector.load %arg7[%c0_39, %c0_40, %c0_41] : memref<1x32x8xbf16, #tpu.memory_space<vmem>>, vector<1x32x8xbf16>
      %65 = vector.shape_cast %64 : vector<1x32x8xbf16> to vector<32x8xbf16>
      %cst_42 = arith.constant dense<0.000000e+00> : vector<8x8xf32>
      %66 = tpu.matmul %56, %65, %cst_42 {dimension_numbers = #tpu.dot_dimension_numbers<[1], [0], [0], [1], [0, 0, 1, 1], [], []>} : vector<8x32xbf16>, vector<32x8xbf16>, vector<8x8xf32> -> vector<8x8xf32>
      %c0_43 = arith.constant 0 : index
      %c0_44 = arith.constant 0 : index
      %c0_45 = arith.constant 0 : index
      %67 = vector.load %arg10[%c0_43, %c0_44, %c0_45] : memref<1x1x8xf32, #tpu.memory_space<vmem>>, vector<1x1x8xf32>
      %68 = vector.shape_cast %67 : vector<1x1x8xf32> to vector<1x8xf32>
      %69 = vector.broadcast %68 : vector<1x8xf32> to vector<8x8xf32>
      %70 = arith.addf %66, %69 : vector<8x8xf32>
      %71 = arith.truncf %63 : vector<8x8xf32> to vector<8x8xbf16>
      %72 = arith.index_cast %arg2 : i32 to index
      %c0_46 = arith.constant 0 : index
      %c0_47 = arith.constant 0 : index
      %73 = vector.load %arg14[%72, %c0_46, %c0_47] : memref<4x8x8xbf16, #tpu.memory_space<vmem>>, vector<1x8x8xbf16>
      %74 = vector.shape_cast %73 : vector<1x8x8xbf16> to vector<8x8xbf16>
      %75 = vector.shape_cast %71 : vector<8x8xbf16> to vector<1x8x8xbf16>
      tpu.vector_store %arg14[%72, %c0_46, %c0_47], %75 {strides = array<i32>} : memref<4x8x8xbf16, #tpu.memory_space<vmem>>, vector<1x8x8xbf16>,
      %76 = arith.truncf %70 : vector<8x8xf32> to vector<8x8xbf16>
      %77 = arith.index_cast %arg2 : i32 to index
      %c0_48 = arith.constant 0 : index
      %c0_49 = arith.constant 0 : index
      %78 = vector.load %arg15[%77, %c0_48, %c0_49] : memref<4x8x8xbf16, #tpu.memory_space<vmem>>, vector<1x8x8xbf16>
      %79 = vector.shape_cast %78 : vector<1x8x8xbf16> to vector<8x8xbf16>
      %80 = vector.shape_cast %76 : vector<8x8xbf16> to vector<1x8x8xbf16>
      tpu.vector_store %arg15[%77, %c0_48, %c0_49], %80 {strides = array<i32>} : memref<4x8x8xbf16, #tpu.memory_space<vmem>>, vector<1x8x8xbf16>,
    } else {
    }
    %c0 = arith.constant 0 : index
    %c0_3 = arith.constant 0 : index
    %c0_4 = arith.constant 0 : index
    %6 = vector.load %arg3[%c0, %c0_3, %c0_4] : memref<1x8x32xf32, #tpu.memory_space<vmem>>, vector<1x8x32xf32>
    %7 = vector.shape_cast %6 : vector<1x8x32xf32> to vector<8x32xf32>
    %8 = arith.truncf %7 : vector<8x32xf32> to vector<8x32xbf16>
    %c0_5 = arith.constant 0 : index
    %c0_6 = arith.constant 0 : index
    %c0_7 = arith.constant 0 : index
    %9 = vector.load %arg5[%c0_5, %c0_6, %c0_7] : memref<1x32x8xbf16, #tpu.memory_space<vmem>>, vector<1x32x8xbf16>
    %10 = vector.shape_cast %9 : vector<1x32x8xbf16> to vector<32x8xbf16>
    %cst = arith.constant dense<0.000000e+00> : vector<8x8xf32>
    %11 = tpu.matmul %8, %10, %cst {dimension_numbers = #tpu.dot_dimension_numbers<[1], [0], [0], [1], [0, 0, 1, 1], [], []>} : vector<8x32xbf16>, vector<32x8xbf16>, vector<8x8xf32> -> vector<8x8xf32>
    %c0_8 = arith.constant 0 : index
    %c0_9 = arith.constant 0 : index
    %c0_10 = arith.constant 0 : index
    %12 = vector.load %arg8[%c0_8, %c0_9, %c0_10] : memref<1x1x8xf32, #tpu.memory_space<vmem>>, vector<1x1x8xf32>
    %13 = vector.shape_cast %12 : vector<1x1x8xf32> to vector<1x8xf32>
    %14 = vector.broadcast %13 : vector<1x8xf32> to vector<8x8xf32>
    %15 = arith.addf %11, %14 : vector<8x8xf32>
    %16 = arith.truncf %15 : vector<8x8xf32> to vector<8x8xbf16>
    %17 = arith.index_cast %arg2 : i32 to index
    %c0_11 = arith.constant 0 : index
    %c0_12 = arith.constant 0 : index
    %18 = vector.load %arg14[%17, %c0_11, %c0_12] : memref<4x8x8xbf16, #tpu.memory_space<vmem>>, vector<1x8x8xbf16>
    %19 = vector.shape_cast %18 : vector<1x8x8xbf16> to vector<8x8xbf16>
    %20 = arith.index_cast %arg2 : i32 to index
    %c0_13 = arith.constant 0 : index
    %c0_14 = arith.constant 0 : index
    %21 = vector.load %arg15[%20, %c0_13, %c0_14] : memref<4x8x8xbf16, #tpu.memory_space<vmem>>, vector<1x8x8xbf16>
    %22 = vector.shape_cast %21 : vector<1x8x8xbf16> to vector<8x8xbf16>
    %cst_15 = arith.constant dense<0.000000e+00> : vector<8x8xf32>
    %23 = tpu.matmul %16, %19, %cst_15 {dimension_numbers = #tpu.dot_dimension_numbers<[1], [1], [0], [0], [0, 0, 1, 0], [], []>} : vector<8x8xbf16>, vector<8x8xbf16>, vector<8x8xf32> -> vector<8x8xf32>
    %c8_i32 = arith.constant 8 : i32
    %24 = arith.muli %arg1, %c8_i32 : i32
    %25 = tpu.iota {dimensions = array<i32: 0>} : vector<8x8xi32>
    %26 = vector.broadcast %24 : i32 to vector<8x8xi32>
    %27 = arith.addi %26, %25 : vector<8x8xi32>
    %28 = tpu.iota {dimensions = array<i32: 1>} : vector<8x8xi32>
    %29 = arith.cmpi sge, %27, %28 : vector<8x8xi32>
    %cst_16 = arith.constant -1.000000e+30 : f32
    %30 = vector.broadcast %cst_16 : f32 to vector<8x8xf32>
    %31 = arith.select %29, %23, %30 : vector<8x8xi1>, vector<8x8xf32>
    %cst_17 = arith.constant dense<0xFF800000> : vector<8xf32>
    %32 = vector.multi_reduction <maximumf>, %31, %cst_17 [1] : vector<8x8xf32> to vector<8xf32>
    %33 = vector.shape_cast %32 : vector<8xf32> to vector<8x1xf32>
    %34 = vector.broadcast %33 : vector<8x1xf32> to vector<8x8xf32>
    %35 = arith.subf %31, %34 : vector<8x8xf32>
    %36 = math.exp %35 : vector<8x8xf32>
    %cst_18 = arith.constant dense<0.000000e+00> : vector<8xf32>
    %37 = vector.multi_reduction <add>, %36, %cst_18 [1] : vector<8x8xf32> to vector<8xf32>
    %38 = vector.shape_cast %37 : vector<8xf32> to vector<8x1xf32>
    %39 = arith.truncf %36 : vector<8x8xf32> to vector<8x8xbf16>
    %cst_19 = arith.constant dense<0.000000e+00> : vector<8x8xf32>
    %40 = tpu.matmul %39, %22, %cst_19 {dimension_numbers = #tpu.dot_dimension_numbers<[1], [0], [0], [1], [0, 0, 1, 1], [], []>} : vector<8x8xbf16>, vector<8x8xbf16>, vector<8x8xf32> -> vector<8x8xf32>
    %41 = tpu.reciprocal %38 {approx = true} : vector<8x1xf32> -> vector<8x1xf32>
    %42 = vector.broadcast %41 : vector<8x1xf32> to vector<8x8xf32>
    %43 = arith.mulf %40, %42 : vector<8x8xf32>
    %c0_20 = arith.constant 0 : index
    %c0_21 = arith.constant 0 : index
    %44 = vector.load %arg16[%c0_20, %c0_21] : memref<8x32xf32, #tpu.memory_space<vmem>>, vector<8x32xf32>
    %45 = arith.truncf %43 : vector<8x8xf32> to vector<8x8xbf16>
    %c0_22 = arith.constant 0 : index
    %c0_23 = arith.constant 0 : index
    %c0_24 = arith.constant 0 : index
    %46 = vector.load %arg11[%c0_22, %c0_23, %c0_24] : memref<1x8x32xbf16, #tpu.memory_space<vmem>>, vector<1x8x32xbf16>
    %47 = vector.shape_cast %46 : vector<1x8x32xbf16> to vector<8x32xbf16>
    %cst_25 = arith.constant dense<0.000000e+00> : vector<8x32xf32>
    %48 = tpu.matmul %45, %47, %cst_25 {dimension_numbers = #tpu.dot_dimension_numbers<[1], [0], [0], [1], [0, 0, 1, 1], [], []>} : vector<8x8xbf16>, vector<8x32xbf16>, vector<8x32xf32> -> vector<8x32xf32>
    %49 = arith.addf %44, %48 : vector<8x32xf32>
    %c0_26 = arith.constant 0 : index
    %c0_27 = arith.constant 0 : index
    %50 = vector.load %arg16[%c0_26, %c0_27] : memref<8x32xf32, #tpu.memory_space<vmem>>, vector<8x32xf32>
    tpu.vector_store %arg16[%c0_26, %c0_27], %49 {strides = array<i32>} : memref<8x32xf32, #tpu.memory_space<vmem>>, vector<8x32xf32>,
    %c3_i32 = arith.constant 3 : i32
    %51 = arith.cmpi eq, %arg2, %c3_i32 : i32
    %52 = arith.extui %51 : i1 to i32
    %c0_i32_28 = arith.constant 0 : i32
    %53 = arith.cmpi ne, %52, %c0_i32_28 : i32
    scf.if %53 {
      %c0_29 = arith.constant 0 : index
      %c0_30 = arith.constant 0 : index
      %54 = vector.load %arg16[%c0_29, %c0_30] : memref<8x32xf32, #tpu.memory_space<vmem>>, vector<8x32xf32>
      %c0_31 = arith.constant 0 : index
      %c0_32 = arith.constant 0 : index
      %55 = vector.load %arg12[%c0_31, %c0_32] : memref<1x32xf32, #tpu.memory_space<vmem>>, vector<1x32xf32>
      %56 = vector.broadcast %55 : vector<1x32xf32> to vector<8x32xf32>
      %57 = arith.addf %54, %56 : vector<8x32xf32>
      %c0_33 = arith.constant 0 : index
      %c0_34 = arith.constant 0 : index
      %c0_35 = arith.constant 0 : index
      %58 = vector.load %arg13[%c0_33, %c0_34, %c0_35] : memref<1x8x32xf32, #tpu.memory_space<vmem>>, vector<1x8x32xf32>
      %59 = vector.shape_cast %58 : vector<1x8x32xf32> to vector<8x32xf32>
      %60 = vector.shape_cast %57 : vector<8x32xf32> to vector<1x8x32xf32>
      tpu.vector_store %arg13[%c0_33, %c0_34, %c0_35], %60 {strides = array<i32>} : memref<1x8x32xf32, #tpu.memory_space<vmem>>, vector<1x8x32xf32>,
    } else {
    }
    return
  }
  func.func @transform_0(%arg0: i32, %arg1: i32, %arg2: i32) -> (i32, i32, i32) {
    %c0_i32 = arith.constant 0 : i32
    %c0_i32_0 = arith.constant 0 : i32
    return %arg0, %arg1, %c0_i32 : i32, i32, i32
  }
  func.func @transform_1(%arg0: i32, %arg1: i32, %arg2: i32) -> (i32, i32, i32) {
    %c0_i32 = arith.constant 0 : i32
    %c0_i32_0 = arith.constant 0 : i32
    %c0_i32_1 = arith.constant 0 : i32
    return %arg0, %c0_i32, %c0_i32_0 : i32, i32, i32
  }
  func.func @transform_2(%arg0: i32, %arg1: i32, %arg2: i32) -> (i32, i32, i32) {
    %c0_i32 = arith.constant 0 : i32
    %c0_i32_0 = arith.constant 0 : i32
    %c0_i32_1 = arith.constant 0 : i32
    return %arg2, %c0_i32, %c0_i32_0 : i32, i32, i32
  }
  func.func @transform_3(%arg0: i32, %arg1: i32, %arg2: i32) -> (i32, i32, i32) {
    %c0_i32 = arith.constant 0 : i32
    %c0_i32_0 = arith.constant 0 : i32
    %c0_i32_1 = arith.constant 0 : i32
    return %arg2, %c0_i32, %c0_i32_0 : i32, i32, i32
  }
  func.func @transform_4(%arg0: i32, %arg1: i32, %arg2: i32) -> (i32, i32, i32) {
    %c0_i32 = arith.constant 0 : i32
    %c0_i32_0 = arith.constant 0 : i32
    %c0_i32_1 = arith.constant 0 : i32
    return %arg2, %c0_i32, %c0_i32_0 : i32, i32, i32
  }
  func.func @transform_5(%arg0: i32, %arg1: i32, %arg2: i32) -> (i32, i32, i32) {
    %c0_i32 = arith.constant 0 : i32
    %c0_i32_0 = arith.constant 0 : i32
    %c0_i32_1 = arith.constant 0 : i32
    return %arg2, %c0_i32, %c0_i32_0 : i32, i32, i32
  }
  func.func @transform_6(%arg0: i32, %arg1: i32, %arg2: i32) -> (i32, i32, i32) {
    %c0_i32 = arith.constant 0 : i32
    %c0_i32_0 = arith.constant 0 : i32
    %c0_i32_1 = arith.constant 0 : i32
    return %arg2, %c0_i32, %c0_i32_0 : i32, i32, i32
  }
  func.func @transform_7(%arg0: i32, %arg1: i32, %arg2: i32) -> (i32, i32, i32) {
    %c0_i32 = arith.constant 0 : i32
    %c0_i32_0 = arith.constant 0 : i32
    %c0_i32_1 = arith.constant 0 : i32
    return %arg2, %c0_i32, %c0_i32_0 : i32, i32, i32
  }
  func.func @transform_8(%arg0: i32, %arg1: i32, %arg2: i32) -> (i32, i32, i32) {
    %c0_i32 = arith.constant 0 : i32
    %c0_i32_0 = arith.constant 0 : i32
    %c0_i32_1 = arith.constant 0 : i32
    return %arg2, %c0_i32, %c0_i32_0 : i32, i32, i32
  }
  func.func @transform_9(%arg0: i32, %arg1: i32, %arg2: i32) -> (i32, i32) {
    %c0_i32 = arith.constant 0 : i32
    %c0_i32_0 = arith.constant 0 : i32
    %c0_i32_1 = arith.constant 0 : i32
    return %c0_i32, %c0_i32_0 : i32, i32
  }
  func.func @transform_10(%arg0: i32, %arg1: i32, %arg2: i32) -> (i32, i32, i32) {
    %c0_i32 = arith.constant 0 : i32
    %c0_i32_0 = arith.constant 0 : i32
    return %arg0, %arg1, %c0_i32 : i32, i32, i32
  }
}

</mosaic_0001>

<bundles_post_ra>
// kernel: tpu_custom_call.1
= control target key start
LH: loop header
LB: loop body
LE: loop exit
PB: predicated region body
PF: predicated region fallthrough
CT: control target
= control target key end

     0   :  { %s1435_s0 = inlined_call_operand.vmem [shape: f32[2,8,32], index: 0, kind: input, shape index: {}]   ;;  %s1436_s1 = inlined_call_operand.vmem [shape: f32[2,8,32], index: 1, kind: input, shape index: {}]   ;;  %s1437_s2 = inlined_call_operand.vmem [shape: bf16[4,32,8], index: 2, kind: input, shape index: {}]   ;;  %s1438_s3 = inlined_call_operand.vmem [shape: bf16[4,32,8], index: 3, kind: input, shape index: {}]   ;;  %s1439_s4 = inlined_call_operand.vmem [shape: bf16[4,32,8], index: 4, kind: input, shape index: {}]   ;;  %s1440_s5 = inlined_call_operand.vmem [shape: f32[4,1,8], index: 5, kind: input, shape index: {}]   ;;  %s1441_s6 = inlined_call_operand.vmem [shape: f32[4,1,8], index: 6, kind: input, shape index: {}]   ;;  %s1442_s7 = inlined_call_operand.vmem [shape: f32[4,1,8], index: 7, kind: input, shape index: {}]   ;;  %s1443_s8 = inlined_call_operand.vmem [shape: bf16[4,8,32], index: 8, kind: input, shape index: {}]   ;;  %s1444_s9 = inlined_call_operand.vmem [shape: f32[1,32], index: 9, kind: input, shape index: {}]   ;;  %s1445_s10 = inlined_call_operand.hbm [shape: f32[2,8,32], index: 10, kind: output, shape index: {}]  }
   0x1   :  { %1460 = sst [smem:[#allocation20_spill]] %s1435_s0 }
   0x2   :  { %1461 = sst [smem:[#allocation21_spill]] %s1436_s1 }
   0x3   :  { %1462 = sst [smem:[#allocation22_spill]] %s1445_s10 }
   0x4   :  { %15 = vsyncpa [#allocation6], 0 }
   0x5   :  { %17 = vsyncpa [#allocation6 + $0x1], 0  ;;  %s1242_s13 = smov 0   ;;  %s1244_s14 = smov 0  }
   0x6   :  { %s1246_s15 = smov 0   ;;  %s1248_s16 = smov 0  }
   0x7   :  { %s1250_s17 = smov 0   ;;  %s1252_s18 = smov 0  }
   0x8   :  { %s1254_s19 = smov 0   ;;  %s1256_s20 = smov 0  }
   0x9 LB: > { %1463 = sst [smem:[#allocation8_spill]] %s1156_s13  ;;  %s946_s21 = sadd.s32 4294967295, %s1184_s20   ;;  %s1184_s20 = sphi %s1256_s20, %s23_s20   ;;  %s1180_s19 = sphi %s1254_s19, %s1495_s19   ;;  %s1176_s18 = sphi %s1252_s18, %s1494_s18   ;;  %s1172_s17 = sphi %s1250_s17, %s1493_s17   ;;  %s1168_s16 = sphi %s1248_s16, %s1492_s16   ;;  %s1164_s15 = sphi %s1246_s15, %s1491_s15   ;;  %s1160_s14 = sphi %s1244_s14, %s1490_s14   ;;  %s1156_s13 = sphi %s1242_s13, %s1489_s13  }
   0xa   : > { %1464 = sst [smem:[#allocation9_spill]] %s1160_s14  ;;  %s947_s22 = sadd.s32 4294967294, %s1184_s20  }
   0xb   : > { %1465 = sst [smem:[#allocation10_spill]] %s1164_s15  ;;  %s35_s23 = sadd.s32 1, %s1176_s18 }
   0xc   : > { %1466 = sst [smem:[#allocation11_spill]] %s1172_s17  ;;  %p36_p0 = scmp.ge.s32.totalorder %s35_s23, 4 }
   0xd   : > { %1467 = sst [smem:[#allocation12_spill]] %s1176_s18  ;;  %s42_s24 = sadd.s32 1, %s1180_s19 }
   0xe   : > { %1468 = sst [smem:[#allocation13_spill]] %s1180_s19  ;;  %p318_p1 = scmp.ne.s32.totalorder %s1164_s15, %s1160_s14 }
   0xf   : > { %1469 = sst [smem:[#allocation14_spill]] %s1184_s20  ;;  %p319_p2 = scmp.eq.s32.totalorder %s946_s21, 7 }
  0x10   : > { %s1497_s23 = smov (%p36_p0, %s35_s23), 0  ;;  %s1499_s24 = smov (!%p36_p0, %s42_s24), %s1180_s19 }
  0x11   : > { %1470 = sst [smem:[#allocation15_spill]] %s1497_s23  ;;  %p1291_p3 = por %p319_p2, %p318_p1 }
  0x12   : > { %p324_p4 = scmp.ne.s32.totalorder %s1160_s14, %s1156_s13  ;;  %p44_p5 = scmp.ge.s32.totalorder %s1499_s24, 2 }
  0x13   : > { %s1471_s25 = scalar_select %p1291_p3, 1, 0 }
  0x14   : > { %p325_p6 = scmp.eq.s32.totalorder %s947_s22, 7  ;;  %p950_p7 = scmp.ge.s32.totalorder %s1184_s20, 1 }
  0x15   : > { %1472 = sst [smem:[#allocation16_spill]] %s1471_s25  ;;  %p412_p8 = scmp.lt.s32.totalorder %s1184_s20, 9 }
  0x16   : > { %s1501_s24 = smov (%p44_p5, %s1499_s24), 0  ;;  %p1301_p9 = por %p325_p6, %p324_p4 }
  0x17   : > { %1473 = sst [smem:[#allocation17_spill]] %s1501_s24  ;;  %p413_p10 = pnand %p950_p7, %p412_p8 }
  0x18   : > { %s1474_s26 = scalar_select %p1301_p9, 1, 0 }
  0x19   : > { %s303_s27 = ssub.s32 %s1180_s19, %s1501_s24  ;;  %s308_s28 = sadd.s32 1, %s1164_s15 }
  0x1a   : > { %1475 = sst [smem:[#allocation18_spill]] %s1474_s26  ;;  %p306_p11 = scmp.eq.s32.totalorder %s303_s27, 0 }
  0x1b   : > { %416 = sbr.rel (%p413_p10) target bundleno = 756 (0x2f4), region = 60  ;;  %s1448_s30 = sand.u32 (!%p413_p10), 1, %s1160_s14  }
  0x1c   : > { %s1309_s29 = scalar_select %p306_p11, %s1164_s15, %s308_s28  }
  0x1d   : > { %p484_p12 = scmp.lt.s32.totalorder (!%p413_p10), %s1172_s17, 1  ;;  %s1315_s11 = sshll.u32 (!%p413_p10), %s1448_s30, 3 }
  0x1e   : > { %1476 = sst [smem:[#allocation19_spill]] %s1309_s29  ;;  %p495_p13 = scmp.lt.s32.totalorder (!%p413_p10), %s1168_s16, 3 }
  0x1f   : > { %s1477_s0 = sld [smem:[#allocation20_spill]] (!%p413_p10)  ;;  %s483_s14 = scalar_lea.vmem (!%p413_p10), [#allocation5], %s1315_s11 }
  0x20   : > { %s485_s12 = scalar_select %p484_p12, %s1172_s17, 1 }
  0x21   : > { %s1320_s21 = scalar_select %p495_p13, %s1168_s16, 3 }
  0x22   : > { %s952_s22 = sshll.u32 %s485_s12, 3  ;;  %s1478_s1 = sld [smem:[#allocation21_spill]] }
  0x23   : > { %s1001_s18 = sshll.u32 %s1320_s21, 4  ;;  %s515_s23 = scalar_lea.vmem %s1441_s6, %s1320_s21 }
  0x24   : > { %s499_s10 = scalar_lea.vmem %s1437_s2, %s1001_s18  ;;  %s504_s12 = scalar_lea.vmem %s1438_s3, %s1001_s18 }
  0x25   : > { %s490_s24 = scalar_lea.vmem %s1477_s0, %s952_s22  ;;  %s509_s28 = scalar_lea.vmem %s1439_s4, %s1001_s18 }
  0x26   : > { %s518_s15 = scalar_lea.vmem %s1442_s7, %s1320_s21  ;;  %s960_s29 = sshll.u32 %s1320_s21, 2 }
  0x27   : > { %s1354_s20 = scalar_lea.vmem %s1443_s8, %s960_s29  ;;  %p961_p0 = scmp.ne.s32.totalorder %s1168_s16, 0 }
  0x28   : > { %s494_s30 = scalar_lea.vmem %s1478_s1, %s952_s22 }
  0x29   : > { %527 = sbr.rel (%p961_p0) target bundleno = 48 (0x30), region = 64 }
  0x2e   : > { %vm528_vm0 = vcmask 261120   ;;  %v1186_v0 = vmov 0.0  }
  0x2f   : > { %529 = vst.msk [vmem:[#allocation4] sm:$0xff] %vm528_vm0, %v1186_v0 }
  0x30 PF: > { %v1005_v1 = vld [vmem:[%s504_s12 + $0x8] sm:$0xff]  ;;  %v1004_v3 = vld [vmem:[%s504_s12] sm:$0xff]  ;;  %vm556_vm1 = vcmask 261120   ;;  %s980_s0 = sshll.u32 %s1168_s16, 2  ;;  %vm609_vm2 = vcmask 60416   ;;  %s1479_s18 = scalar_lea.vmem %s1440_s5, %s1320_s21  ;;  %vm661_vm3 = vcmask 64512   ;;  %v682_v29 = vlaneseq }
  0x31   : > { %v1009_v2 = vld [vmem:[%s499_s10 + $0x8] sm:$0xff]  ;;  %v1008_v4 = vld [vmem:[%s499_s10] sm:$0xff]  ;;  %566 = vmatpush.bf16.msra.mxu0 %v1005_v1  ;;  %s608_s1 = scalar_lea.vmem [#allocation2], %s980_s0  ;;  %s613_s26 = scalar_lea.vmem [#allocation3], %s980_s0  ;;  %vm703_vm4 = vcmask 1043456  }
  0x32   : > { %v534_v5 = vld [vmem:[%s494_s30] sm:$0xff]  ;;  %647 = vmatpush.bf16.msra.mxu2 %v1009_v2  ;;  %v1007_v9 = vld [vmem:[%s509_s28 + $0x8] sm:$0xff]  ;;  %v683_v31 = vshrl.u32 %v682_v29, 7  ;;  %v687_v32 = vand.u32 127, %v682_v29  ;;  %p996_p1 = scmp.ne.s32.totalorder %s1168_s16, 3 }
  0x33   : > { %v615_v6 = vld [vmem:[%s490_s24] sm:$0xff]  ;;  %v535_v7 = vpack.c.bf16 %v534_v5, %v534_v5  ;;  %599 = vmatpush.bf16.msra.mxu1 %v1007_v9 }
  0x34   : > { %v616_v8 = vpack.c.bf16 %v615_v6, %v615_v6  ;;  %v1006_v10 = vld [vmem:[%s509_s28] sm:$0xff]  ;;  %vm688_vm5 = vcmp.ge.s32.totalorder %v683_v31, %v687_v32 }
  0x35   : > { %567 = vmatpush.bf16.msra.mxu0 %v1004_v3  ;;  %v1082_v11 = vld [vmem:[%s515_s23] ss:$0 sm:$0xff] }
  0x36   : > { %648 = vmatpush.bf16.msra.mxu2 %v1008_v4  ;;  %v1083_v17 = vld [vmem:[%s1479_s18] ss:$0 sm:$0xff] }
  0x37   : > { %600 = vmatpush.bf16.msra.mxu1 %v1006_v10  ;;  %v1084_v23 = vld [vmem:[%s518_s15] ss:$0 sm:$0xff] }
  0x38   : > { %970 = vmatmul.msk.bf16.vlgmr.msra.gmra.mxu0 %vm556_vm1, %v535_v7  ;;  %v724_v37 = vld [vmem:[%s1354_s20] sm:$0xf] }
  0x39   : > { %990 = vmatmul.msk.bf16.vlgmr.msra.gmra.mxu2 %vm556_vm1, %v616_v8  ;;  %v729_v38 = vsel %vm703_vm4, %v724_v37, 0  ;;  %v722_v51 = vld [vmem:[#allocation4] sm:$0xff] }
  0x3a   : > { %979 = vmatmul.msk.bf16.vlgmr.msra.gmra.mxu1 %vm556_vm1, %v535_v7 }
  0x3b   : > { %738 = vmatpush.bf16.msrb.mxu1 %v729_v38 }
  0xb5   : > { %v569_v12 = vpop.f32.mrf.mxu0 }
  0xb6   : > { %v570_v13 = vadd.f32 %v1082_v11, %v569_v12 }
  0xb7   : > { %v602_v24 = vpop.f32.mrf.mxu1 }
  0xb8   : > { %v606_v14 = vpack.c.bf16 %v570_v13, %v570_v13  ;;  %v603_v25 = vadd.f32 %v1084_v23, %v602_v24 }
  0xba   : > { %610 = vst.msk [vmem:[%s608_s1] sm:$0xf] %vm609_vm2, %v606_v14  ;;  %v611_v26 = vpack.c.bf16 %v603_v25, %v603_v25 }
  0xbc   : > { %v650_v15 = vpop.f32.mrf.mxu2  ;;  %614 = vst.msk [vmem:[%s613_s26] sm:$0xf] %vm609_vm2, %v611_v26 }
  0xbd   : > { %v571_v16 = vpop.f32.mrf.mxu0  ;;  %v651_v19 = vadd.f32 %v1083_v17, %v650_v15 }
  0xbf   : > { %v654_v22 = vpack.c.bf16 %v651_v19, %v651_v19  ;;  %v604_v27 = vpop.f32.mrf.mxu1 }
  0xc1   : > { %v657_v18 = vld [vmem:[%s608_s1] sm:$0xf] }
  0xc2   : > { %v666_v20 = vsel %vm661_vm3, %v657_v18, 0 }
  0xc3   : > { %675 = vmatpush.bf16.xpose.msra.mxu3 %v666_v20  ;;  %v660_v28 = vld [vmem:[%s613_s26] sm:$0xf] }
  0xc4   : > { %v652_v21 = vpop.f32.mrf.mxu2  ;;  %v705_v30 = vsel %vm703_vm4, %v660_v28, 0 }
  0xc5   : > { %714 = vmatpush.bf16.msrb.mxu0 %v705_v30 }
  0xca   : > { %993 = vmatmul.msk.bf16.vlgmr.msra.gmra.mxu3 %vm661_vm3, %v654_v22 }
 0x14d   : > { %v677_v33 = vpop.f32.mrf.mxu3 }
 0x14e   : > { %v689_v34 = vsel %vm688_vm5, %v677_v33, -1e+30 }
 0x14f   : > { %v690_v35 = vsel %vm661_vm3, %v689_v34, -inf }
 0x150   : > { %691 = vmax.xlane.f32.xlu0 %v690_v35 }
 0x155   : > { %v679_v36 = vpop.f32.mrf.mxu3 }
 0x1c3   : > { %v692_v39 = vpop.xlane.xlu0 %691 }
 0x1c4   : > { %v693_v40 = vsub.f32 %v689_v34, %v692_v39 }
 0x1c6   : > { %v694_v41 = vmul.f32 1.442695, %v693_v40 }
 0x1c8   : > { %1085 = vpow2.f32 %v694_v41 }
 0x1ce   : > { %v1086_v42 = vpop.eup %1085 }
 0x1cf   : > { %v696_v43 = vsel %vm661_vm3, %v1086_v42, 0.0  ;;  %v699_v44 = vpack.c.bf16 %v1086_v42, %v1086_v42 }
 0x1d0   : > { %697 = vadd.xlane.f32.xlu0 %v696_v43 }
 0x1d1   : > { %994 = vmatmul.msk.bf16.vlgmr.msrb.gmra.mxu0 %vm661_vm3, %v699_v44 }
 0x243   : > { %v698_v45 = vpop.xlane.xlu0 %697 }
 0x244   : > { %1087 = vrcp.f32 %v698_v45 }
 0x24a   : > { %v1088_v46 = vpop.eup %1087 }
 0x24e   : > { %v716_v47 = vpop.f32.mrf.mxu0 }
 0x24f   : > { %v721_v48 = vmul.f32 %v1088_v46, %v716_v47 }
 0x251   : > { %v723_v49 = vpack.c.bf16 %v721_v48, %v721_v48 }
 0x253   : > { %995 = vmatmul.msk.bf16.vlgmr.msrb.gmra.mxu1 %vm661_vm3, %v723_v49 }
 0x256   : > { %v718_v50 = vpop.f32.mrf.mxu0 }
 0x2d0   : > { %v740_v52 = vpop.f32.mrf.mxu1 }
 0x2d1   : > { %v744_v53 = vadd.f32 %v740_v52, %v722_v51 }
 0x2d3   : > { %745 = vst.msk [vmem:[#allocation4] sm:$0xff] %vm556_vm1, %v744_v53 }
 0x2d4   : > { %749 = sbr.rel (%p996_p1) target bundleno = 734 (0x2de), region = 72 }
 0x2d8   : > { %v742_v54 = vpop.f32.mrf.mxu1 }
 0x2d9   : > { %v1089_v56 = vld [vmem:[%s1444_s9] ss:$0 sm:$0xff] }
 0x2da   : > { %v750_v55 = vld [vmem:[#allocation4] sm:$0xff] }
 0x2db   : > { %v755_v57 = vadd.f32 %v1089_v56, %v750_v55 }
 0x2dd   : > { %756 = vst.msk [vmem:[%s483_s14] sm:$0xff] %vm556_vm1, %v755_v57 }
 0x2de PF: > { %s1480_s12 = sld [smem:[#allocation11_spill]]  ;;  %s771_s13 = sshll.u32 %s483_s14, 4  ;;  %s772_s13 = int_to_ptr.vmem [resolvable:$true] %s771_s13 }
 0x2df   : > { %s1481_s27 = sld [smem:[#allocation9_spill]] }
 0x2e0   : > { %s1483_s16 = sld [smem:[#allocation22_spill]] }
 0x2e4   : > { %s998_s19 = sshll.u32 %s1480_s12, 3 }
 0x2e5   : > { %s1485_s0 = sand.u32 1, %s1481_s27  }
 0x2e6   : > { %s1484_s29 = smov %s1483_s16  ;;  %s769_s15 = scalar_lea.hbm %s1483_s16, %s998_s19 }
 0x2e7   : > { %s773_s20 = sshll.u32 %s769_s15, 4  ;;  %s758_s1 = scalar_lea.sflag [#allocation6], %s1485_s0  ;;  %s774_s20 = int_to_ptr.hbm [resolvable:$true] %s773_s20 }
 0x2e8   : > { %s1104_s10 = sshra.s32 %s774_s20, 4  ;;  %s1110_s25 = scalar_lea.hbm %s1484_s29, 16  ;;  %s1105_s10 = int_to_ptr.hbm [resolvable:$true] %s1104_s10 }
 0x2e9   : > { %s1106_s17 = scalar_lea.hbm %s1105_s10, 8  ;;  %p1111_p6 = scmp.lt.s32.totalorder %s1105_s10, %s1484_s29 }
 0x2ea   : > { %p1107_p2 = scmp.ne.s32.totalorder %s1105_s10, %s1106_s17  ;;  %p1112_p7 = scmp.lt.s32.totalorder %s1110_s25, %s1106_s17 }
 0x2ec   : > { %p1108_p4 = pnand %p1107_p2, %p1291_p3  ;;  %p1113_p8 = por %p1112_p7, %p1111_p6 }
 0x2ee   : > { %p1109_p5 = pneg %p1108_p4 }
 0x2f0   : > { %p1114_p10 = pnand %p1113_p8, %p1109_p5 }
 0x2f2   : > { %1117 = shalt.err (!%p1114_p10)
}
 0x2f3   : > { %1010 = dma.vmem_to_hbm [thread:$0]  (%p1291_p3), %s772_s13, 128, %s774_s20, %s758_s1  }
 0x2f4 PF: > { %s1486_s11 = sld [smem:[#allocation14_spill]] }
 0x2f5   : > { %s1487_s14 = sld [smem:[#allocation8_spill]] }
 0x2fa   : > { %p1016_p11 = scmp.ge.s32.totalorder %s1486_s11, 2 }
 0x2fb   : > { %s785_s12 = sand.u32 1, %s1487_s14  }
 0x2fc   : > { %p1013_p12 = pnand %p1016_p11, %p1301_p9  ;;  %s786_s27 = scalar_lea.sflag [#allocation6], %s785_s12 }
 0x2fe   : > { %p1014_p13 = pneg %p1013_p12 }
 0x300   : > { %1151 = dma.done.wait (%p1014_p13), %s786_s27, 128  }
 0x301   : > { %1153 = vsyncadd (%p1014_p13), %s786_s27, 4294967168  ;;  %s23_s20 = sadd.s32 1, %s1486_s11   ;;  %s1489_s13 = sld [smem:[#allocation9_spill]] }
 0x302   : > { %p20_p0 = scmp.ge.s32.totalorder %s23_s20, 10   ;;  %s1490_s14 = sld [smem:[#allocation10_spill]] }
 0x303   : > { %s1491_s15 = sld [smem:[#allocation19_spill]] }
 0x304   : > { %s1492_s16 = sld [smem:[#allocation12_spill]]  ;;  %22 = sbr.rel (!%p20_p0) target bundleno = 9 (0x9), region = 135 }
 0x305   : > { %s1493_s17 = sld [smem:[#allocation13_spill]] }
 0x306   : > { %s1494_s18 = sld [smem:[#allocation15_spill]] }
 0x307   : > { %s1495_s19 = sld [smem:[#allocation17_spill]] }
 0x309   :  { %792 = vsyncpa [#allocation6], 1 }
 0x30a   :  { %794 = vsyncpa [#allocation6 + $0x1], 1 }

</bundles_post_ra>
